<compile_context>
chip_gen: v5e
topology: v5e:2x2
jax: 0.10.0
libtpu: 0.0.40
codegen_flags: <defaults>
</compile_context>

<pallas_src>
import jax
import jax.numpy as jnp
from jax.experimental import pallas as pl
from jax.experimental.pallas import tpu as pltpu


def _round_up(x, m):
    return (x + m - 1) // m * m


def _pick_tile_s(S, B, itemsize, k_pad, cout_pad,
                 cap_lanes=8192, vmem_budget=16 * 1024 * 1024):
    """Pick a lane-dense (multiple-of-128) spatial tile size."""
    S128 = _round_up(S, 128)
    m = S128 // 128
    # Keep double-buffered x + out tiles comfortably inside scoped VMEM.
    cap_lanes = min(cap_lanes, vmem_budget // (2 * itemsize * (k_pad + cout_pad)))
    cap_m = max(1, min(cap_lanes // 128, m))
    if B == 1 and m >= 2:
        # Ensure >= 2 spatial tiles so both v7x TensorCores get work.
        cap_m = max(1, min(cap_m, m // 2))
    # Prefer a tile that divides round_up(S,128): then S_pad == round_up(S,128)
    # and no extra activation-pad / output-slice copy pass is needed.
    div = max(d for d in range(1, cap_m + 1) if m % d == 0)
    if div == m or div * 128 >= 1024:
        return 128 * div
    # Otherwise split into near-equal tiles (minimal padding).
    n_tiles = -(-m // cap_m)
    return 128 * (-(-m // n_tiles))


def _focus_matmul_kernel(x_ref, w_ref, b_ref, o_ref):
    # x_ref: (K_pad, TILE_S)      space-to-depth activations (one batch, one spatial tile)
    # w_ref: (Cout_pad, K_pad)    conv weight with BN scale folded in (grid-invariant)
    # b_ref: (Cout_pad, 1)        folded BN bias, f32 (grid-invariant)
    # o_ref: (Cout_pad, TILE_S)   output tile (lane-dense: TILE_S is a multiple of 128)
    acc = jnp.dot(w_ref[...], x_ref[...], preferred_element_type=jnp.float32)  # MXU, f32 acc
    y = acc + b_ref[...]
    # SiLU epilogue in f32: sigmoid -> EUP, mul -> VPU (v5e has no bf16 VPU/EUP).
    o_ref[...] = (y * jax.nn.sigmoid(y)).astype(o_ref.dtype)


def focus_forward(x_nchw, conv_w, bn_gamma, bn_beta, bn_mean, bn_var,
                  eps=1e-5, stream_dtype=None):
    """Focus forward pass.

    x_nchw : (B, Cin, H, W)
    conv_w : (Cout, 4*Cin, 1, 1)   (PyTorch Conv2d weight layout)
    bn_*   : (Cout,)               BatchNorm eval-mode params / running stats
    stream_dtype : dtype used for the big HBM streams (x, w, out); defaults to
                   x dtype.  Use jnp.bfloat16 to halve HBM traffic; the MXU
                   accumulation and the bias+SiLU epilogue stay in f32.
    returns: (B, Cout, H//2, W//2) in stream_dtype.
    """
    B, Cin, H, W = x_nchw.shape
    Cout = conv_w.shape[0]
    Ho, Wo = H // 2, W // 2
    K = 4 * Cin
    S = Ho * Wo

    stream_dtype = jnp.dtype(x_nchw.dtype if stream_dtype is None else stream_dtype)

    # ---- tiling / padding decisions ------------------------------------------
    # Minimal sublane rounding only (8 for 32-bit, 16 for bf16); do NOT pad
    # channels toward MXU-native sizes — the kernel is HBM-bound, not MXU-bound.
    sub = 16 if stream_dtype.itemsize < 4 else 8
    K_pad = _round_up(K, sub)
    Cout_pad = _round_up(Cout, sub)
    TILE_S = _pick_tile_s(S, B, stream_dtype.itemsize, K_pad, Cout_pad)
    S_pad = _round_up(S, TILE_S)
    n_s_tiles = S_pad // TILE_S

    # ---- space-to-depth (single fused prep pass; channel order tl, bl, tr, br,
    # matching torch.cat in Focus.forward) --------------------------------------
    tl = x_nchw[..., ::2, ::2]
    tr = x_nchw[..., ::2, 1::2]
    bl = x_nchw[..., 1::2, ::2]
    br = x_nchw[..., 1::2, 1::2]
    x_sd = jnp.concatenate((tl, bl, tr, br), axis=1).reshape(B, K, S)  # no transpose
    if (K_pad, S_pad) != (K, S):
        # Single pad op covering both K and S padding (fuses with the concat).
        x_sd = jnp.pad(x_sd, ((0, 0), (0, K_pad - K), (0, S_pad - S)))
    x_mat = x_sd.astype(stream_dtype).reshape(B * K_pad, S_pad)

    # ---- fold BatchNorm into the conv weight / bias (host-side, tiny) ---------
    scale = bn_gamma / jnp.sqrt(bn_var + eps)                       # (Cout,)
    w_folded = conv_w.reshape(Cout, K) * scale[:, None]             # (Cout, K)
    bias = bn_beta - bn_mean * scale                                # (Cout,)
    w_folded = jnp.pad(w_folded, ((0, Cout_pad - Cout), (0, K_pad - K))).astype(stream_dtype)
    bias = jnp.pad(bias, (0, Cout_pad - Cout)).reshape(Cout_pad, 1).astype(jnp.float32)

    cost = pl.CostEstimate(
        flops=2 * B * S_pad * K_pad * Cout_pad,
        transcendentals=B * S_pad * Cout_pad,
        bytes_accessed=(stream_dtype.itemsize
                        * (B * K_pad * S_pad + Cout_pad * K_pad + B * Cout_pad * S_pad)
                        + 4 * Cout_pad),
    )

    # ---- Pallas hot path: (Cout,K) @ (K, TILE_S) + bias + SiLU ----------------
    out_mat = pl.pallas_call(
        _focus_matmul_kernel,
        out_shape=jax.ShapeDtypeStruct((B * Cout_pad, S_pad), stream_dtype),
        grid_spec=pltpu.PrefetchScalarGridSpec(
            num_scalar_prefetch=0,
            grid=(B, n_s_tiles),
            in_specs=[
                # TODO(synk): sweep pipeline_mode=pl.Buffered(3) on this spec if
                # per-step DMA latency is still exposed after the larger tiles.
                pl.BlockSpec((K_pad, TILE_S), lambda b, j: (b, j)),
                pl.BlockSpec((Cout_pad, K_pad), lambda b, j: (0, 0)),   # grid-invariant
                pl.BlockSpec((Cout_pad, 1), lambda b, j: (0, 0)),       # grid-invariant
            ],
            out_specs=pl.BlockSpec((Cout_pad, TILE_S), lambda b, j: (b, j)),
        ),
        compiler_params=pltpu.CompilerParams(
            dimension_semantics=("parallel", "parallel"),   # megacore-friendly
            vmem_limit_bytes=32 * 1024 * 1024,              # matters on v5e (16 MiB default)
        ),
        cost_estimate=cost,
    )(x_mat, w_folded, bias)

    # ---- back to NCHW (contiguous reshape; slices are no-ops when no padding) -
    out = out_mat.reshape(B, Cout_pad, S_pad)[:, :Cout, :S].reshape(B, Cout, Ho, Wo)
    return out


if __name__ == "__main__":
    # Small deterministic example consistent with the module:
    # Focus(in_channels=4, out_channels=8, ksize=1, stride=1, act='silu')
    B, Cin, H, W = 2, 4, 16, 16
    Cout = 8

    key = jax.random.PRNGKey(0)
    kx, kw, kg, kb, km, kv = jax.random.split(key, 6)

    x = jax.random.normal(kx, (B, Cin, H, W), dtype=jnp.float32)
    # Conv2d(4*Cin, Cout, 1, 1, bias=False) weight
    conv_w = jax.random.normal(kw, (Cout, 4 * Cin, 1, 1), dtype=jnp.float32) * 0.1
    # BatchNorm2d(Cout) parameters / running stats (eval-mode semantics)
    bn_gamma = 1.0 + 0.1 * jax.random.normal(kg, (Cout,), dtype=jnp.float32)
    bn_beta = 0.1 * jax.random.normal(kb, (Cout,), dtype=jnp.float32)
    bn_mean = 0.1 * jax.random.normal(km, (Cout,), dtype=jnp.float32)
    bn_var = jnp.abs(1.0 + 0.1 * jax.random.normal(kv, (Cout,), dtype=jnp.float32))

    out = focus_forward(x, conv_w, bn_gamma, bn_beta, bn_mean, bn_var)
    jax.block_until_ready(out)

    # pure-JAX reference of the same math (channel order tl, bl, tr, br, as in
    # the PyTorch Focus.forward torch.cat)
    tl = x[..., ::2, ::2]; tr = x[..., ::2, 1::2]
    bl = x[..., 1::2, ::2]; br = x[..., 1::2, 1::2]
    x_sd = jnp.concatenate((tl, bl, tr, br), axis=1)
    y_ref = jnp.einsum("bkhw,ok->bohw", x_sd, conv_w.reshape(Cout, 4 * Cin))
    scale = bn_gamma / jnp.sqrt(bn_var + 1e-5)
    y_ref = y_ref * scale[None, :, None, None] + (bn_beta - bn_mean * scale)[None, :, None, None]
    y_ref = y_ref * jax.nn.sigmoid(y_ref)

    assert out.shape == (B, Cout, H // 2, W // 2)
    assert out.dtype == jnp.float32
    assert jnp.allclose(out, y_ref, atol=1e-5, rtol=1e-5)

    # bf16 streaming path (memory-bound kernel -> ~halves HBM bytes); looser tol.
    out_bf16 = focus_forward(x, conv_w, bn_gamma, bn_beta, bn_mean, bn_var,
                             stream_dtype=jnp.bfloat16)
    jax.block_until_ready(out_bf16)
    assert out_bf16.dtype == jnp.bfloat16
    assert out_bf16.shape == (B, Cout, H // 2, W // 2)
    assert jnp.allclose(out_bf16.astype(jnp.float32), y_ref, atol=5e-2, rtol=5e-2)

    print("KERNEL_OK")
</pallas_src>

<mosaic_0001>
module attributes {stable_mosaic.version = 11 : i64} {
  func.func @_focus_matmul_kernel(%arg0: i32, %arg1: i32, %arg2: memref<16x128xf32, #tpu.memory_space<vmem>>, %arg3: memref<8x16xf32, #tpu.memory_space<vmem>>, %arg4: memref<8x1xf32, #tpu.memory_space<vmem>>, %arg5: memref<8x128xf32, #tpu.memory_space<vmem>>) attributes {dimension_semantics = [#tpu.dimension_semantics<parallel>, #tpu.dimension_semantics<parallel>], iteration_bounds = array<i64: 2, 1>, scalar_prefetch = 0 : i64, scratch_operands = 0 : i64, tpu.core_type = #tpu.core_type<tc>, window_params = [{transform_indices = @transform_0, window_bounds = array<i64: 16, 128>}, {pipeline_mode = #tpu.pipeline_mode<synchronous>, transform_indices = @transform_1, window_bounds = array<i64: 8, 16>}, {pipeline_mode = #tpu.pipeline_mode<synchronous>, transform_indices = @transform_2, window_bounds = array<i64: 8, 1>}, {transform_indices = @transform_3, window_bounds = array<i64: 8, 128>}]} {
    %c0 = arith.constant 0 : index
    %c0_0 = arith.constant 0 : index
    %0 = vector.load %arg3[%c0, %c0_0] : memref<8x16xf32, #tpu.memory_space<vmem>>, vector<8x16xf32>
    %c0_1 = arith.constant 0 : index
    %c0_2 = arith.constant 0 : index
    %1 = vector.load %arg2[%c0_1, %c0_2] : memref<16x128xf32, #tpu.memory_space<vmem>>, vector<16x128xf32>
    %cst = arith.constant dense<0.000000e+00> : vector<8x128xf32>
    %2 = tpu.matmul %0, %1, %cst {dimension_numbers = #tpu.dot_dimension_numbers<[1], [0], [0], [1], [0, 0, 1, 1], [], []>} : vector<8x16xf32>, vector<16x128xf32>, vector<8x128xf32> -> vector<8x128xf32>
    %c0_3 = arith.constant 0 : index
    %c0_4 = arith.constant 0 : index
    %3 = vector.load %arg4[%c0_3, %c0_4] : memref<8x1xf32, #tpu.memory_space<vmem>>, vector<8x1xf32>
    %4 = vector.broadcast %3 : vector<8x1xf32> to vector<8x128xf32>
    %5 = arith.addf %2, %4 : vector<8x128xf32>
    %6 = arith.negf %5 : vector<8x128xf32>
    %7 = math.exp %6 : vector<8x128xf32>
    %cst_5 = arith.constant 1.000000e+00 : f32
    %8 = vector.broadcast %cst_5 : f32 to vector<8x128xf32>
    %9 = arith.addf %8, %7 : vector<8x128xf32>
    %10 = arith.divf %8, %9 : vector<8x128xf32>
    %11 = arith.mulf %5, %10 : vector<8x128xf32>
    %c0_6 = arith.constant 0 : index
    %c0_7 = arith.constant 0 : index
    %12 = vector.load %arg5[%c0_6, %c0_7] : memref<8x128xf32, #tpu.memory_space<vmem>>, vector<8x128xf32>
    tpu.vector_store %arg5[%c0_6, %c0_7], %11 {strides = array<i32>} : memref<8x128xf32, #tpu.memory_space<vmem>>, vector<8x128xf32>,
    return
  }
  func.func @transform_0(%arg0: i32, %arg1: i32) -> (i32, i32) {
    %c0_i32 = arith.constant 0 : i32
    return %arg0, %arg1 : i32, i32
  }
  func.func @transform_1(%arg0: i32, %arg1: i32) -> (i32, i32) {
    %c0_i32 = arith.constant 0 : i32
    %c0_i32_0 = arith.constant 0 : i32
    %c0_i32_1 = arith.constant 0 : i32
    return %c0_i32, %c0_i32_0 : i32, i32
  }
  func.func @transform_2(%arg0: i32, %arg1: i32) -> (i32, i32) {
    %c0_i32 = arith.constant 0 : i32
    %c0_i32_0 = arith.constant 0 : i32
    %c0_i32_1 = arith.constant 0 : i32
    return %c0_i32, %c0_i32_0 : i32, i32
  }
  func.func @transform_3(%arg0: i32, %arg1: i32) -> (i32, i32) {
    %c0_i32 = arith.constant 0 : i32
    return %arg0, %arg1 : i32, i32
  }
}

</mosaic_0001>

<bundles_post_ra>
// kernel: tpu_custom_call.1
= control target key start
LH: loop header
LB: loop body
LE: loop exit
PB: predicated region body
PF: predicated region fallthrough
CT: control target
= control target key end

     0   :  { %8 = vsyncpa [#allocation3], 0  ;;  %s712_s0 = inlined_call_operand.hbm [shape: f32[32,128], index: 0, kind: input, shape index: {}]   ;;  %s713_s1 = inlined_call_operand.vmem [shape: f32[8,16], index: 1, kind: input, shape index: {}]   ;;  %s714_s2 = inlined_call_operand.vmem [shape: f32[8,1], index: 2, kind: input, shape index: {}]   ;;  %s715_s3 = inlined_call_operand.hbm [shape: f32[16,128], index: 3, kind: output, shape index: {}]  }
   0x1   :  { %10 = vsyncpa [#allocation3 + $0x1], 0 }
   0x2   :  { %11 = vsyncpa [#allocation4], 0 }
   0x3   :  { %13 = vsyncpa [#allocation4 + $0x1], 0  ;;  %s585_s12 = smov 0   ;;  %s587_s13 = smov 0  }
   0x4   :  { %s589_s14 = smov 0   ;;  %s591_s15 = smov 0  }
   0x5   :  { %s593_s16 = smov 0   ;;  %s595_s17 = smov 0  }
   0x6 LB: > { %s361_s18 = sadd.s32 4294967295, %s560_s17   ;;  %s362_s19 = sadd.s32 4294967294, %s560_s17   ;;  %s560_s17 = sphi %s595_s17, %s19_s17   ;;  %s556_s16 = sphi %s593_s16, %s724_s16   ;;  %s552_s15 = sphi %s591_s15, %s723_s15   ;;  %s548_s14 = sphi %s589_s14, %s722_s14   ;;  %s544_s13 = sphi %s587_s13, %s721_s13   ;;  %s540_s12 = sphi %s585_s12, %s720_s12  }
   0x7   : > { %s31_s20 = sadd.s32 1, %s556_s16  ;;  %s40_s21 = sadd.s32 1, %s548_s14 }
   0x8   : > { %p33_p0 = scmp.ge.s32.totalorder %s31_s20, 2  ;;  %p47_p1 = scmp.ne.s32.totalorder %s548_s14, %s544_s13 }
   0x9   : > { %p48_p2 = scmp.eq.s32.totalorder %s560_s17, 0  ;;  %p53_p3 = scmp.ne.s32.totalorder %s544_s13, %s540_s12 }
   0xa   : > { %s726_s20 = smov (%p33_p0, %s31_s20), 0  ;;  %p54_p5 = scmp.eq.s32.totalorder %s361_s18, 0 }
   0xb   : > { %p626_p4 = por %p48_p2, %p47_p1  ;;  %s35_s23 = ssub.s32 %s556_s16, %s726_s20 }
   0xc   : > { %p121_p6 = scmp.eq.s32.totalorder %s361_s18, 1  ;;  %p38_p7 = scmp.eq.s32.totalorder %s35_s23, 0 }
   0xd   : > { %p632_p8 = por %p54_p5, %p53_p3  ;;  %p127_p10 = scmp.eq.s32.totalorder %s362_s19, 1 }
   0xe   : > { %p636_p9 = por %p121_p6, %p47_p1  ;;  %p364_p12 = scmp.ge.s32.totalorder %s560_s17, 2 }
   0xf   : > { %s641_s26 = scalar_select %p38_p7, %s548_s14, %s40_s21  }
  0x10   : > { %p643_p11 = por %p127_p10, %p53_p3  ;;  %p390_p13 = scmp.lt.s32.totalorder %s560_s17, 2 }
  0x11   : > { %s153_s28 = sand.u32 1, %s548_s14   ;;  %s377_s30 = sshll.u32 %s556_s16, 4 }
  0x12   : > { %s365_s29 = sshll.u32 %s153_s28, 4  ;;  %s163_s6 = scalar_lea.hbm %s712_s0, %s377_s30 }
  0x13   : > { %s157_s7 = scalar_lea.vmem [#allocation2], %s365_s29  ;;  %s164_s9 = sshll.u32 %s163_s6, 4  ;;  %s165_s9 = int_to_ptr.hbm [resolvable:$true] %s164_s9 }
  0x14   : > { %s166_s8 = sshll.u32 %s157_s7, 4  ;;  %p383_p0 = pnand %p390_p13, %p626_p4  ;;  %s167_s8 = int_to_ptr.vmem [resolvable:$true] %s166_s8 }
  0x15   : > { %p368_p1 = scmp.ge.s32.totalorder %s560_s17, 1  ;;  %s154_s10 = scalar_lea.sflag [#allocation3], %s153_s28 }
  0x16   : > { %s562_s11 = smov 128   ;;  %s563_s18 = smov 8  }
  0x17   : > { %385 = dma.hbm_to_vmem [thread:$0]  (!%p383_p0), %s165_s9, 256, %s167_s8, %s154_s10, %s562_s11, %s562_s11, %s563_s18  }
  0x18   : > { %p174_p2 = scmp.lt.s32.totalorder %s560_s17, 3 }
  0x1a   : > { %p175_p3 = pnand %p368_p1, %p174_p2 }
  0x1b   : > { %s659_s19 = sand.u32 (!%p175_p3), 1, %s544_s13  }
  0x1c   : > { %178 = sbr.rel (%p175_p3) target bundleno = 199 (0xc7), region = 32  ;;  %s369_s21 = sshll.u32 (!%p175_p3), %s659_s19, 4 }
  0x1d   : > { %s181_s23 = scalar_lea.sflag (!%p175_p3), [#allocation3], %s659_s19  ;;  %s184_s29 = scalar_lea.vmem (!%p175_p3), [#allocation2], %s369_s21 }
  0x21   : > { %531 = dma.done.wait (%p632_p8), %s181_s23, 256  }
  0x22   : > { %533 = vsyncadd (%p632_p8), %s181_s23, 4294967040  ;;  %v564_v0 = vmov 0   ;;  %v211_v1 = vld [vmem:[%s184_s29 + $0x8] sm:$0xff]  ;;  %v210_v2 = vld [vmem:[%s184_s29] sm:$0xff]  ;;  %vm218_vm0 = vcmask 130048   ;;  %s370_s24 = sshll.u32 %s659_s19, 3 }
  0x23   : > { %443 = vset.pattern.permute.xlu0 %v564_v0  ;;  %236 = vmatpush.msra.mxu0 %v211_v1  ;;  %v209_v3 = vld [vmem:[%s713_s1] sm:$0xff]  ;;  %s374_s5 = sshll.u32 %s552_s15, 3  ;;  %s207_s9 = scalar_lea.vmem [#allocation5], %s370_s24 }
  0x24   : > { %v212_v4 = vld [vmem:[%s714_s2] sm:$0xff]  ;;  %s275_s8 = scalar_lea.hbm %s715_s3, %s374_s5  ;;  %s277_s10 = sshll.u32 %s207_s9, 4  ;;  %s278_s10 = int_to_ptr.vmem [resolvable:$true] %s277_s10 }
  0x25   : > { %215 = vperm.xlu0 %443, %v212_v4   ;;  %237 = vmatpush.msra.mxu0 %v210_v2  ;;  %s279_s11 = sshll.u32 %s275_s8, 4  ;;  %s264_s15 = scalar_lea.sflag [#allocation4], %s659_s19  ;;  %s280_s11 = int_to_ptr.hbm [resolvable:$true] %s279_s11 }
  0x26   : > { %371 = vmatmul.msk.f32.vlgmr.msra.gmra.mxu0 %vm218_vm0, %v209_v3  ;;  %s492_s18 = sshra.s32 %s280_s11, 4  ;;  %s498_s22 = scalar_lea.hbm %s715_s3, 16  ;;  %s493_s18 = int_to_ptr.hbm [resolvable:$true] %s492_s18 }
  0x27   : > { %s494_s21 = scalar_lea.hbm %s493_s18, 8  ;;  %p499_p7 = scmp.lt.s32.totalorder %s493_s18, %s715_s3 }
  0x28   : > { %p495_p4 = scmp.ne.s32.totalorder %s493_s18, %s494_s21  ;;  %p500_p8 = scmp.lt.s32.totalorder %s498_s22, %s494_s21 }
  0x2a   : > { %p496_p5 = pnand %p495_p4, %p636_p9  ;;  %p501_p10 = por %p500_p8, %p499_p7 }
  0x2c   : > { %p497_p6 = pneg %p496_p5 }
  0x2e   : > { %p502_p13 = pnand %p501_p10, %p497_p6 }
  0x97   : > { %v216_v5 = vpop.permute.xlu0 %215 }
  0xa3   : > { %v239_v6 = vpop.f32.mrf.mxu0 }
  0xa4   : > { %v240_v7 = vadd.f32 %v239_v6, %v216_v5 }
  0xa6   : > { %v372_v8 = vmul.f32 -1.442695, %v240_v7 }
  0xa8   : > { %444 = vpow2.f32 %v372_v8 }
  0xae   : > { %v445_v9 = vpop.eup %444 }
  0xaf   : > { %v245_v10 = vadd.f32 1.0, %v445_v9 }
  0xb1   : > { %446 = vrcp.f32 %v245_v10  ;;  %v257_v14 = vand.u32 2147483648, %v245_v10  ;;  %v255_v16 = vand.u32 2147483647, %v245_v10  ;;  %vm251_vm2 = vweird.f32 %v245_v10 }
  0xb3   : > { %v258_v18 = vor.u32 1.1754944e-38, %v257_v14  ;;  %vm256_vm4 = vcmp.eq.f32.partialorder %v255_v16, 8.507059e+37 }
  0xb7   : > { %v447_v11 = vpop.eup %446 }
  0xb8   : > { %v247_v12 = vmul.f32 %v447_v11, %v245_v10  ;;  %vm252_vm1 = vweird.f32 %v447_v11 }
  0xb9   : > { %vm253_vm3 = vmor %vm251_vm2, %vm252_vm1 }
  0xba   : > { %v248_v13 = vsub.f32 1.0, %v247_v12 }
  0xbc   : > { %v249_v15 = vmul.f32 %v447_v11, %v248_v13 }
  0xbe   : > { %v250_v17 = vadd.f32 %v447_v11, %v249_v15 }
  0xc0   : > { %v254_v19 = vsel %vm253_vm3, %v447_v11, %v250_v17 }
  0xc1   : > { %v259_v20 = vsel %vm256_vm4, %v258_v18, %v254_v19 }
  0xc2   : > { %v261_v21 = vmul.f32 %v259_v20, %v240_v7 }
  0xc4   : > { %262 = vst [vmem:[%s207_s9] sm:$0xff] %v261_v21 }
  0xc5   : > { %505 = shalt.err (!%p502_p13)
}
  0xc6   : > { %380 = dma.vmem_to_hbm [thread:$0]  (%p636_p9), %s278_s10, 128, %s280_s11, %s264_s15  }
  0xc7 PF: > { %s291_s19 = sand.u32 1, %s540_s12   ;;  %p387_p0 = pnand %p364_p12, %p643_p11 }
  0xc8   : > { %s292_s4 = scalar_lea.sflag [#allocation4], %s291_s19 }
  0xc9   : > { %p388_p1 = pneg %p387_p0 }
  0xcb   : > { %535 = dma.done.wait (%p388_p1), %s292_s4, 128  }
  0xcc   : > { %537 = vsyncadd (%p388_p1), %s292_s4, 4294967168  ;;  %s19_s17 = sadd.s32 1, %s560_s17   ;;  %s720_s12 = smov %s544_s13 }
  0xcd   : > { %p16_p2 = scmp.ge.s32.totalorder %s19_s17, 4   ;;  %s721_s13 = smov %s548_s14 }
  0xce   : > { %s722_s14 = smov %s641_s26  ;;  %s723_s15 = smov %s556_s16 }
  0xcf   : > { %s724_s16 = smov %s726_s20  ;;  %18 = sbr.rel (!%p16_p2) target bundleno = 6 (0x6), region = 77 }
  0xd4   :  { %298 = vsyncpa [#allocation3], 1 }
  0xd5   :  { %300 = vsyncpa [#allocation3 + $0x1], 1 }
  0xd6   :  { %301 = vsyncpa [#allocation4], 1 }
  0xd7   :  { %303 = vsyncpa [#allocation4 + $0x1], 1 }

</bundles_post_ra>
